<compile_context>
chip_gen: v7x
topology: tpu7x:2x2x1
jax: 0.10.0
libtpu: 0.0.40
codegen_flags: <defaults>
</compile_context>

<pallas_src>
import functools

import jax
import jax.numpy as jnp
from jax.experimental import pallas as pl
from jax.experimental.pallas import tpu as pltpu


def _make_dense_kernel(x_ref, w_ref, b_ref, o_ref, k_scratch, *, h, w, c_in, c_out):
    """One batch image per grid step.

    x_ref:     (1, C_in, (H+2)*W + 2) row-padded, flattened image in f32
               (+1 zero guard element on each end of the flat axis).
    w_ref:     (C_out, 9*C_in)        bf16 weights, column = (kh*3+kw)*C_in + c.
    b_ref:     (C_out, 1)             f32 bias.
    o_ref:     (1, C_in+C_out, H*W)   f32 output slab (input channels first).
    k_scratch: (9*C_in, H*W)          f32 VMEM staging for the tap matrix.
    """
    hw = h * w
    xg = x_ref[0]                                    # (C_in, (H+2)*W + 2)

    # --- channel-concat part: copy the input channels straight through ------
    # Original pixel (i, j) sits at flat index (i+1)*W + j + 1 in xg.
    o_ref[0, pl.ds(0, c_in), :] = xg[:, w + 1:w + 1 + hw].astype(o_ref.dtype)

    # --- column-boundary masks on the flattened index p = i*W + j -----------
    pos = jax.lax.broadcasted_iota(jnp.int32, (1, hw), 1)
    if w & (w - 1) == 0:
        col = jnp.bitwise_and(pos, w - 1)            # power-of-two width
    else:
        col = jax.lax.rem(pos, w)
    col_gt0 = col > 0                                # j > 0      (valid for kw == 0)
    col_ltw = col < (w - 1)                          # j < W - 1  (valid for kw == 2)

    # --- build the (9*C_in, HW) tap matrix in VMEM scratch -------------------
    # Tap (kh, kw) of output pixel p reads xg[:, p + kh*W + kw]; the zero rows
    # added by the host-side H padding (plus the flat-axis guard elements)
    # provide the top/bottom halo, the masks provide the left/right halo.
    for kh in range(3):
        for kw in range(3):
            t = xg[:, kh * w + kw: kh * w + kw + hw]            # (C_in, HW)
            if kw == 0:
                t = jnp.where(col_gt0, t, 0.0)
            elif kw == 2:
                t = jnp.where(col_ltw, t, 0.0)
            k_scratch[pl.ds((kh * 3 + kw) * c_in, c_in), :] = t

    # --- one MXU contraction with K = 9*C_in, bf16 in / f32 accumulate ------
    kmat = k_scratch[...].astype(jnp.bfloat16)                  # (9*C_in, HW)
    acc = jnp.dot(w_ref[...], kmat,
                  preferred_element_type=jnp.float32)           # (C_out, HW) f32
    acc = acc + b_ref[...]                                      # bias, lane bcast
    o_ref[0, pl.ds(c_in, c_out), :] = jnp.maximum(acc, 0.0).astype(o_ref.dtype)


def make_dense_forward(x_nchw, weight, bias):
    """Equivalent of Make_Dense.forward: concat([x, relu(conv3x3(x))], dim=1)."""
    n, c_in, h, w = x_nchw.shape
    c_out = weight.shape[0]
    hw = h * w
    pw = (h + 2) * w + 2                 # flat length incl. halo rows + guards

    # --- glue: cheap layout prep (~1.13x of x, vs 9x for host-side im2col) ---
    x_hpad = jnp.pad(x_nchw, ((0, 0), (0, 0), (1, 1), (0, 0)))      # zero rows
    x_flat = jnp.pad(x_hpad.reshape(n, c_in, (h + 2) * w),
                     ((0, 0), (0, 0), (1, 1)))                      # guard elems

    # OIHW (C_out, C_in, 3, 3) -> (C_out, 9*C_in); column = (kh*3+kw)*C_in + c,
    # matching the tap order built in the kernel.  bf16 for the MXU.
    w_mat = jnp.transpose(weight, (0, 2, 3, 1)).reshape(c_out, 9 * c_in)
    w_mat = w_mat.astype(jnp.bfloat16)
    b_col = bias.reshape(c_out, 1).astype(jnp.float32)

    kernel = functools.partial(_make_dense_kernel, h=h, w=w, c_in=c_in, c_out=c_out)
    out_flat = pl.pallas_call(
        kernel,
        out_shape=jax.ShapeDtypeStruct((n, c_in + c_out, hw), x_nchw.dtype),
        grid_spec=pltpu.PrefetchScalarGridSpec(
            num_scalar_prefetch=0,
            grid=(n,),
            in_specs=[
                pl.BlockSpec((1, c_in, pw), lambda i: (i, 0, 0)),
                pl.BlockSpec((c_out, 9 * c_in), lambda i: (0, 0)),
                pl.BlockSpec((c_out, 1), lambda i: (0, 0)),
            ],
            out_specs=pl.BlockSpec((1, c_in + c_out, hw), lambda i: (i, 0, 0)),
            scratch_shapes=[pltpu.VMEM((9 * c_in, hw), jnp.float32)],
        ),
        compiler_params=pltpu.CompilerParams(
            dimension_semantics=("parallel",),
            vmem_limit_bytes=32 * 1024 * 1024,
        ),
    )(x_flat, w_mat, b_col)

    # free reshape: (N, C_in+C_out, H*W) -> NCHW, no transpose needed.
    return out_flat.reshape(n, c_in + c_out, h, w)


if __name__ == "__main__":
    N, C_IN, C_OUT, H, W = 2, 4, 8, 16, 16

    key = jax.random.PRNGKey(0)
    k_x, k_w, k_b = jax.random.split(key, 3)
    x = jax.random.normal(k_x, (N, C_IN, H, W), dtype=jnp.float32)
    # deterministic synthetic parameters (PyTorch Conv2d shapes: OIHW weight, (O,) bias)
    weight = 0.1 * jax.random.normal(k_w, (C_OUT, C_IN, 3, 3), dtype=jnp.float32)
    bias = 0.1 * jax.random.normal(k_b, (C_OUT,), dtype=jnp.float32)

    fwd = jax.jit(make_dense_forward)
    out = jax.block_until_ready(fwd(x, weight, bias))
    assert out.shape == (N, C_IN + C_OUT, H, W), out.shape

    # pure-JAX f32 reference; kernel uses bf16 MXU inputs (f32 accumulation),
    # so compare with a bf16-sized tolerance.
    conv = jax.lax.conv_general_dilated(
        x, weight, window_strides=(1, 1), padding=((1, 1), (1, 1)),
        dimension_numbers=("NCHW", "OIHW", "NCHW"))
    ref = jnp.concatenate(
        [x, jnp.maximum(conv + bias[None, :, None, None], 0.0)], axis=1)
    max_err = float(jnp.max(jnp.abs(out - ref)))
    assert jnp.allclose(out, ref, atol=5e-2, rtol=5e-2), max_err

    print("KERNEL_OK")
</pallas_src>

<mosaic_0001>
module attributes {stable_mosaic.version = 11 : i64} {
  func.func @_make_dense_kernel(%arg0: i32, %arg1: memref<1x4x290xf32, #tpu.memory_space<vmem>>, %arg2: memref<8x36xbf16, #tpu.memory_space<vmem>>, %arg3: memref<8x1xf32, #tpu.memory_space<vmem>>, %arg4: memref<1x12x256xf32, #tpu.memory_space<vmem>>, %arg5: memref<36x256xf32, #tpu.memory_space<vmem>>) attributes {dimension_semantics = [#tpu.dimension_semantics<parallel>], iteration_bounds = array<i64: 2>, scalar_prefetch = 0 : i64, scratch_operands = 1 : i64, tpu.core_type = #tpu.core_type<tc>, window_params = [{transform_indices = @transform_0, window_bounds = array<i64: 1, 4, 290>}, {pipeline_mode = #tpu.pipeline_mode<synchronous>, transform_indices = @transform_1, window_bounds = array<i64: 8, 36>}, {pipeline_mode = #tpu.pipeline_mode<synchronous>, transform_indices = @transform_2, window_bounds = array<i64: 8, 1>}, {transform_indices = @transform_3, window_bounds = array<i64: 1, 12, 256>}]} {
    %c0 = arith.constant 0 : index
    %c0_0 = arith.constant 0 : index
    %c0_1 = arith.constant 0 : index
    %0 = vector.load %arg1[%c0, %c0_0, %c0_1] : memref<1x4x290xf32, #tpu.memory_space<vmem>>, vector<1x4x290xf32>
    %1 = vector.shape_cast %0 : vector<1x4x290xf32> to vector<4x290xf32>
    %2 = vector.extract_strided_slice %1 {offsets = [0, 17], sizes = [4, 256], strides = [1, 1]} : vector<4x290xf32> to vector<4x256xf32>
    %c0_2 = arith.constant 0 : index
    %c0_3 = arith.constant 0 : index
    %c0_4 = arith.constant 0 : index
    %3 = vector.load %arg4[%c0_2, %c0_3, %c0_4] : memref<1x12x256xf32, #tpu.memory_space<vmem>>, vector<1x4x256xf32>
    %4 = vector.shape_cast %3 : vector<1x4x256xf32> to vector<4x256xf32>
    %5 = vector.shape_cast %2 : vector<4x256xf32> to vector<1x4x256xf32>
    tpu.vector_store %arg4[%c0_2, %c0_3, %c0_4], %5 {strides = array<i32>} : memref<1x12x256xf32, #tpu.memory_space<vmem>>, vector<1x4x256xf32>,
    %6 = tpu.iota {dimensions = array<i32: 1>} : vector<1x256xi32>
    %c15_i32 = arith.constant 15 : i32
    %7 = vector.broadcast %c15_i32 : i32 to vector<1x256xi32>
    %8 = arith.andi %6, %7 : vector<1x256xi32>
    %c0_i32 = arith.constant 0 : i32
    %9 = vector.broadcast %c0_i32 : i32 to vector<1x256xi32>
    %10 = arith.cmpi sgt, %8, %9 : vector<1x256xi32>
    %c15_i32_5 = arith.constant 15 : i32
    %11 = vector.broadcast %c15_i32_5 : i32 to vector<1x256xi32>
    %12 = arith.cmpi slt, %8, %11 : vector<1x256xi32>
    %13 = vector.extract_strided_slice %1 {offsets = [0, 0], sizes = [4, 256], strides = [1, 1]} : vector<4x290xf32> to vector<4x256xf32>
    %cst = arith.constant 0.000000e+00 : f32
    %14 = vector.shape_cast %10 : vector<1x256xi1> to vector<1x256xi1>
    %15 = vector.broadcast %14 : vector<1x256xi1> to vector<4x256xi1>
    %16 = vector.broadcast %cst : f32 to vector<4x256xf32>
    %17 = arith.select %15, %13, %16 : vector<4x256xi1>, vector<4x256xf32>
    %c0_6 = arith.constant 0 : index
    %c0_7 = arith.constant 0 : index
    %18 = vector.load %arg5[%c0_6, %c0_7] : memref<36x256xf32, #tpu.memory_space<vmem>>, vector<4x256xf32>
    tpu.vector_store %arg5[%c0_6, %c0_7], %17 {strides = array<i32>} : memref<36x256xf32, #tpu.memory_space<vmem>>, vector<4x256xf32>,
    %19 = vector.extract_strided_slice %1 {offsets = [0, 1], sizes = [4, 256], strides = [1, 1]} : vector<4x290xf32> to vector<4x256xf32>
    %c4 = arith.constant 4 : index
    %c0_8 = arith.constant 0 : index
    %20 = vector.load %arg5[%c4, %c0_8] : memref<36x256xf32, #tpu.memory_space<vmem>>, vector<4x256xf32>
    tpu.vector_store %arg5[%c4, %c0_8], %19 {strides = array<i32>} : memref<36x256xf32, #tpu.memory_space<vmem>>, vector<4x256xf32>,
    %21 = vector.extract_strided_slice %1 {offsets = [0, 2], sizes = [4, 256], strides = [1, 1]} : vector<4x290xf32> to vector<4x256xf32>
    %cst_9 = arith.constant 0.000000e+00 : f32
    %22 = vector.shape_cast %12 : vector<1x256xi1> to vector<1x256xi1>
    %23 = vector.broadcast %22 : vector<1x256xi1> to vector<4x256xi1>
    %24 = vector.broadcast %cst_9 : f32 to vector<4x256xf32>
    %25 = arith.select %23, %21, %24 : vector<4x256xi1>, vector<4x256xf32>
    %c8 = arith.constant 8 : index
    %c0_10 = arith.constant 0 : index
    %26 = vector.load %arg5[%c8, %c0_10] : memref<36x256xf32, #tpu.memory_space<vmem>>, vector<4x256xf32>
    tpu.vector_store %arg5[%c8, %c0_10], %25 {strides = array<i32>} : memref<36x256xf32, #tpu.memory_space<vmem>>, vector<4x256xf32>,
    %27 = vector.extract_strided_slice %1 {offsets = [0, 16], sizes = [4, 256], strides = [1, 1]} : vector<4x290xf32> to vector<4x256xf32>
    %cst_11 = arith.constant 0.000000e+00 : f32
    %28 = vector.shape_cast %10 : vector<1x256xi1> to vector<1x256xi1>
    %29 = vector.broadcast %28 : vector<1x256xi1> to vector<4x256xi1>
    %30 = vector.broadcast %cst_11 : f32 to vector<4x256xf32>
    %31 = arith.select %29, %27, %30 : vector<4x256xi1>, vector<4x256xf32>
    %c12 = arith.constant 12 : index
    %c0_12 = arith.constant 0 : index
    %32 = vector.load %arg5[%c12, %c0_12] : memref<36x256xf32, #tpu.memory_space<vmem>>, vector<4x256xf32>
    tpu.vector_store %arg5[%c12, %c0_12], %31 {strides = array<i32>} : memref<36x256xf32, #tpu.memory_space<vmem>>, vector<4x256xf32>,
    %33 = vector.extract_strided_slice %1 {offsets = [0, 17], sizes = [4, 256], strides = [1, 1]} : vector<4x290xf32> to vector<4x256xf32>
    %c16 = arith.constant 16 : index
    %c0_13 = arith.constant 0 : index
    %34 = vector.load %arg5[%c16, %c0_13] : memref<36x256xf32, #tpu.memory_space<vmem>>, vector<4x256xf32>
    tpu.vector_store %arg5[%c16, %c0_13], %33 {strides = array<i32>} : memref<36x256xf32, #tpu.memory_space<vmem>>, vector<4x256xf32>,
    %35 = vector.extract_strided_slice %1 {offsets = [0, 18], sizes = [4, 256], strides = [1, 1]} : vector<4x290xf32> to vector<4x256xf32>
    %cst_14 = arith.constant 0.000000e+00 : f32
    %36 = vector.shape_cast %12 : vector<1x256xi1> to vector<1x256xi1>
    %37 = vector.broadcast %36 : vector<1x256xi1> to vector<4x256xi1>
    %38 = vector.broadcast %cst_14 : f32 to vector<4x256xf32>
    %39 = arith.select %37, %35, %38 : vector<4x256xi1>, vector<4x256xf32>
    %c20 = arith.constant 20 : index
    %c0_15 = arith.constant 0 : index
    %40 = vector.load %arg5[%c20, %c0_15] : memref<36x256xf32, #tpu.memory_space<vmem>>, vector<4x256xf32>
    tpu.vector_store %arg5[%c20, %c0_15], %39 {strides = array<i32>} : memref<36x256xf32, #tpu.memory_space<vmem>>, vector<4x256xf32>,
    %41 = vector.extract_strided_slice %1 {offsets = [0, 32], sizes = [4, 256], strides = [1, 1]} : vector<4x290xf32> to vector<4x256xf32>
    %cst_16 = arith.constant 0.000000e+00 : f32
    %42 = vector.shape_cast %10 : vector<1x256xi1> to vector<1x256xi1>
    %43 = vector.broadcast %42 : vector<1x256xi1> to vector<4x256xi1>
    %44 = vector.broadcast %cst_16 : f32 to vector<4x256xf32>
    %45 = arith.select %43, %41, %44 : vector<4x256xi1>, vector<4x256xf32>
    %c24 = arith.constant 24 : index
    %c0_17 = arith.constant 0 : index
    %46 = vector.load %arg5[%c24, %c0_17] : memref<36x256xf32, #tpu.memory_space<vmem>>, vector<4x256xf32>
    tpu.vector_store %arg5[%c24, %c0_17], %45 {strides = array<i32>} : memref<36x256xf32, #tpu.memory_space<vmem>>, vector<4x256xf32>,
    %47 = vector.extract_strided_slice %1 {offsets = [0, 33], sizes = [4, 256], strides = [1, 1]} : vector<4x290xf32> to vector<4x256xf32>
    %c28 = arith.constant 28 : index
    %c0_18 = arith.constant 0 : index
    %48 = vector.load %arg5[%c28, %c0_18] : memref<36x256xf32, #tpu.memory_space<vmem>>, vector<4x256xf32>
    tpu.vector_store %arg5[%c28, %c0_18], %47 {strides = array<i32>} : memref<36x256xf32, #tpu.memory_space<vmem>>, vector<4x256xf32>,
    %49 = vector.extract_strided_slice %1 {offsets = [0, 34], sizes = [4, 256], strides = [1, 1]} : vector<4x290xf32> to vector<4x256xf32>
    %cst_19 = arith.constant 0.000000e+00 : f32
    %50 = vector.shape_cast %12 : vector<1x256xi1> to vector<1x256xi1>
    %51 = vector.broadcast %50 : vector<1x256xi1> to vector<4x256xi1>
    %52 = vector.broadcast %cst_19 : f32 to vector<4x256xf32>
    %53 = arith.select %51, %49, %52 : vector<4x256xi1>, vector<4x256xf32>
    %c32 = arith.constant 32 : index
    %c0_20 = arith.constant 0 : index
    %54 = vector.load %arg5[%c32, %c0_20] : memref<36x256xf32, #tpu.memory_space<vmem>>, vector<4x256xf32>
    tpu.vector_store %arg5[%c32, %c0_20], %53 {strides = array<i32>} : memref<36x256xf32, #tpu.memory_space<vmem>>, vector<4x256xf32>,
    %c0_21 = arith.constant 0 : index
    %c0_22 = arith.constant 0 : index
    %55 = vector.load %arg5[%c0_21, %c0_22] : memref<36x256xf32, #tpu.memory_space<vmem>>, vector<36x256xf32>
    %56 = arith.truncf %55 : vector<36x256xf32> to vector<36x256xbf16>
    %c0_23 = arith.constant 0 : index
    %c0_24 = arith.constant 0 : index
    %57 = vector.load %arg2[%c0_23, %c0_24] : memref<8x36xbf16, #tpu.memory_space<vmem>>, vector<8x36xbf16>
    %cst_25 = arith.constant dense<0.000000e+00> : vector<8x256xf32>
    %58 = tpu.matmul %57, %56, %cst_25 {dimension_numbers = #tpu.dot_dimension_numbers<[1], [0], [0], [1], [0, 0, 1, 1], [], []>} : vector<8x36xbf16>, vector<36x256xbf16>, vector<8x256xf32> -> vector<8x256xf32>
    %c0_26 = arith.constant 0 : index
    %c0_27 = arith.constant 0 : index
    %59 = vector.load %arg3[%c0_26, %c0_27] : memref<8x1xf32, #tpu.memory_space<vmem>>, vector<8x1xf32>
    %60 = vector.broadcast %59 : vector<8x1xf32> to vector<8x256xf32>
    %61 = arith.addf %58, %60 : vector<8x256xf32>
    %cst_28 = arith.constant 0.000000e+00 : f32
    %62 = vector.broadcast %cst_28 : f32 to vector<8x256xf32>
    %63 = arith.maximumf %61, %62 : vector<8x256xf32>
    %c0_29 = arith.constant 0 : index
    %c4_30 = arith.constant 4 : index
    %c0_31 = arith.constant 0 : index
    %64 = vector.load %arg4[%c0_29, %c4_30, %c0_31] : memref<1x12x256xf32, #tpu.memory_space<vmem>>, vector<1x8x256xf32>
    %65 = vector.shape_cast %64 : vector<1x8x256xf32> to vector<8x256xf32>
    %66 = vector.shape_cast %63 : vector<8x256xf32> to vector<1x8x256xf32>
    tpu.vector_store %arg4[%c0_29, %c4_30, %c0_31], %66 {strides = array<i32>} : memref<1x12x256xf32, #tpu.memory_space<vmem>>, vector<1x8x256xf32>,
    return
  }
  func.func @transform_0(%arg0: i32) -> (i32, i32, i32) {
    %c0_i32 = arith.constant 0 : i32
    %c0_i32_0 = arith.constant 0 : i32
    %c0_i32_1 = arith.constant 0 : i32
    return %arg0, %c0_i32, %c0_i32_0 : i32, i32, i32
  }
  func.func @transform_1(%arg0: i32) -> (i32, i32) {
    %c0_i32 = arith.constant 0 : i32
    %c0_i32_0 = arith.constant 0 : i32
    %c0_i32_1 = arith.constant 0 : i32
    return %c0_i32, %c0_i32_0 : i32, i32
  }
  func.func @transform_2(%arg0: i32) -> (i32, i32) {
    %c0_i32 = arith.constant 0 : i32
    %c0_i32_0 = arith.constant 0 : i32
    %c0_i32_1 = arith.constant 0 : i32
    return %c0_i32, %c0_i32_0 : i32, i32
  }
  func.func @transform_3(%arg0: i32) -> (i32, i32, i32) {
    %c0_i32 = arith.constant 0 : i32
    %c0_i32_0 = arith.constant 0 : i32
    %c0_i32_1 = arith.constant 0 : i32
    return %arg0, %c0_i32, %c0_i32_0 : i32, i32, i32
  }
}

</mosaic_0001>

<bundles_post_ra>
// kernel: make_dense_forward.1
= control target key start
LH: loop header
LB: loop body
LE: loop exit
PB: predicated region body
PF: predicated region fallthrough
CT: control target
= control target key end

     0   :  { %s543_s12 = smov 0   ;;  %s632_s0 = inlined_call_operand.vmem [shape: f32[2,4,290], index: 0, kind: input, shape index: {}]   ;;  %s633_s1 = inlined_call_operand.vmem [shape: bf16[8,36], index: 1, kind: input, shape index: {}]   ;;  %s634_s2 = inlined_call_operand.vmem [shape: f32[8,1], index: 2, kind: input, shape index: {}]   ;;  %s635_s3 = inlined_call_operand.vmem [shape: f32[2,12,256], index: 3, kind: output, shape index: {}]  }
   0x1 LB: > { %s471_s13 = sadd.s32 4294967295, %s512_s12   ;;  %p475_p0 = scmp.ge.s32.totalorder %s512_s12, 1  ;;  %s512_s12 = sphi %s543_s12, %s13_s12  }
   0x2   : > { %p137_p1 = scmp.lt.s32.totalorder %s512_s12, 3 }
   0x4   : > { %p138_p2 = pnand %p475_p0, %p137_p1 }
   0x5   : > { %p161_p3 = scmp.lt.s32.totalorder (!%p138_p2), %s471_s13, 1  ;;  %v190_v0 = vlaneseq (!%p138_p2)  ;;  %s514_s18 = smov (!%p138_p2), 112   ;;  %v522_v14 = vmov (!%p138_p2), 0   ;;  %v346_v15 = vld [vmem:[%s634_s2] sm:$0xff] (!%p138_p2)  ;;  %vm233_vm2 = vcmask (!%p138_p2), 1031168   ;;  %vm248_vm3 = vcmask (!%p138_p2), 916480  }
   0x6   : > { %141 = sbr.rel (%p138_p2) target bundleno = 413 (0x19d), region = 32  ;;  %s515_s19 = smov (!%p138_p2), 126   ;;  %395 = vmatprep.mubr.bf16.mxu0 (!%p138_p2), %v522_v14  ;;  %502 = vset.pattern.permute.xlu0 (!%p138_p2), %v522_v14  ;;  %vm216_vm5 = vcmask (!%p138_p2), 1039360   ;;  %vm271_vm7 = vcmask (!%p138_p2), 900096   ;;  %vm292_vm8 = vcmask (!%p138_p2), 785408   ;;  %vm183_vm9 = vcmask (!%p138_p2), 908288  }
   0x7   : > { %v553_v1 = vand.u32 (!%p138_p2), 127, %v190_v0  ;;  %s516_s20 = smov (!%p138_p2), 127   ;;  %s517_s21 = smov (!%p138_p2), 110   ;;  %vm307_vm10 = vcmask (!%p138_p2), 777216   ;;  %vm320_vm11 = vcmask (!%p138_p2), 769024   ;;  %vm356_vm12 = vcmask (!%p138_p2), 1041408  }
   0x8   : > { %s518_s22 = smov (!%p138_p2), 96   ;;  %s519_s23 = smov (!%p138_p2), 111   ;;  %v345_v20 = vld [vmem:[%s633_s1] sm:$0xf] (!%p138_p2)  ;;  %vm352_vm13 = vcmask (!%p138_p2), 293888  }
   0x9   : > { %v192_v2 = vadd.s32 (!%p138_p2), 128, %v553_v1  ;;  %v193_v3 = vand.u32 (!%p138_p2), 15, %v553_v1  ;;  %s520_s24 = smov (!%p138_p2), 95   ;;  %s521_s25 = smov (!%p138_p2), 94  }
   0xb   : > { %v194_v4 = vand.u32 (!%p138_p2), 15, %v192_v2  ;;  %vm563_vm0 = vcmp.gt.s32.totalorder (!%p138_p2), %v193_v3, 0  ;;  %vm591_vm6 = vcmp.lt.s32.totalorder (!%p138_p2), %v193_v3, 15 }
   0xd   : > { %s645_s13 = smov (!%p161_p3, %s471_s13), 1  ;;  %vm567_vm1 = vcmp.gt.s32.totalorder %v194_v4, 0  ;;  %vm578_vm4 = vcmp.lt.s32.totalorder %v194_v4, 15 }
   0xe   : > { %s484_s14 = smul.u32 12, %s645_s13  ;;  %s483_s28 = sshll.u32 %s645_s13, 5 }
   0xf   : > { %s611_s4 = scalar_lea.vmem %s635_s3, %s483_s28 }
  0x10   : > { %s165_s17 = scalar_lea.vmem %s632_s0, %s484_s14 }
  0x11   : > { %v173_v5 = vld [vmem:[%s165_s17 + $0x8] sm:$0xf]  ;;  %v172_v6 = vld [vmem:[%s165_s17] sm:$0xff] }
  0x12   : > { %246 = vrot.lane.b32.xlu0 %v173_v5, %s514_s18  ;;  %242 = vrot.lane.b32.xlu1 %v172_v6, %s514_s18  ;;  %v176_v7 = vcombine.high %v172_v6, %v172_v6  ;;  %v204_v10 = vsel %vm563_vm0, %v172_v6, 0.0  ;;  %v209_v12 = vcombine.low %v173_v5, %v173_v5  ;;  %v208_v13 = vcombine.low %v172_v6, %v172_v6 }
  0x13   : > { %206 = vst [vmem:[#allocation2] sm:$0xf] %v204_v10 }
  0x14   : > { %v205_v11 = vsel %vm567_vm1, %v176_v7, 0.0 }
  0x15   : > { %207 = vst [vmem:[#allocation2 + $0x8] sm:$0xf] %v205_v11 }
  0x16   : > { %231 = vrot.lane.b32.xlu0 %v173_v5, %s515_s19  ;;  %212 = vrot.lane.b32.xlu1 %v172_v6, %s516_s20 }
  0x1a   : > { %229 = vrot.lane.b32.xlu1 %v176_v7, %s515_s19  ;;  %244 = vrot.lane.b32.xlu0 %v176_v7, %s514_s18 }
  0x1e   : > { %227 = vrot.lane.b32.xlu1 %v172_v6, %s515_s19  ;;  %214 = vrot.lane.b32.xlu0 %v209_v12, %s516_s20 }
  0x22   : > { %267 = vrot.lane.b32.xlu1 %v176_v7, %s517_s21  ;;  %210 = vrot.lane.b32.xlu0 %v208_v13, %s516_s20 }
  0x26   : > { %265 = vrot.lane.b32.xlu1 %v172_v6, %s517_s21  ;;  %269 = vrot.lane.b32.xlu0 %v173_v5, %s517_s21 }
  0x2a   : > { %290 = vrot.lane.b32.xlu1 %v173_v5, %s518_s22  ;;  %288 = vrot.lane.b32.xlu0 %v176_v7, %s518_s22 }
  0x2e   : > { %181 = vrot.lane.b32.xlu1 %v173_v5, %s519_s23  ;;  %179 = vrot.lane.b32.xlu0 %v176_v7, %s519_s23 }
  0x32   : > { %303 = vrot.lane.b32.xlu1 %v172_v6, %s520_s24  ;;  %286 = vrot.lane.b32.xlu0 %v172_v6, %s518_s22 }
  0x36   : > { %177 = vrot.lane.b32.xlu1 %v172_v6, %s519_s23  ;;  %305 = vrot.lane.b32.xlu0 %v209_v12, %s520_s24 }
  0x3a   : > { %314 = vrot.lane.b32.xlu1 %v172_v6, %s521_s25  ;;  %301 = vrot.lane.b32.xlu0 %v208_v13, %s520_s24 }
  0x3e   : > { %318 = vrot.lane.b32.xlu1 %v173_v5, %s521_s25  ;;  %316 = vrot.lane.b32.xlu0 %v176_v7, %s521_s25 }
  0x42   : > { %349 = vperm.xlu0 %502, %v346_v15  }
  0x84   : > { %v247_v16 = vpop.permute.xlu0 %246  ;;  %v243_v17 = vpop.permute.xlu1 %242 }
  0x88   : > { %v232_v18 = vpop.permute.xlu0 %231  ;;  %v213_v19 = vpop.permute.xlu1 %212 }
  0x8c   : > { %v230_v21 = vpop.permute.xlu1 %229  ;;  %v245_v22 = vpop.permute.xlu0 %244 }
  0x8d   : > { %v235_v23 = vsel %vm233_vm2, %v230_v21, %v232_v18  ;;  %v249_v24 = vsel %vm248_vm3, %v243_v17, %v245_v22  ;;  %v250_v25 = vsel %vm248_vm3, %v245_v22, %v247_v16 }
  0x8e   : > { %v239_v26 = vsel %vm578_vm4, %v235_v23, 0.0  ;;  %v253_v27 = vsel %vm563_vm0, %v249_v24, 0.0  ;;  %v254_v28 = vsel %vm567_vm1, %v250_v25, 0.0 }
  0x8f   : > { %241 = vst [vmem:[#allocation2 + $0x18] sm:$0xf] %v239_v26  ;;  %v257_v29 = vrot.slane %v253_v27, 4  ;;  %v258_v30 = vrot.slane %v254_v28, 4 }
  0x90   : > { %v228_v32 = vpop.permute.xlu1 %227  ;;  %v215_v33 = vpop.permute.xlu0 %214 }
  0x91   : > { %261 = vst [vmem:[#allocation2 + $0x10] sm:$0xf0] %v257_v29  ;;  %262 = vst [vmem:[#allocation2 + $0x18] sm:$0xf0] %v258_v30  ;;  %v234_v34 = vsel %vm233_vm2, %v228_v32, %v230_v21  ;;  %v218_v35 = vsel %vm216_vm5, %v213_v19, %v215_v33 }
  0x92   : > { %v238_v36 = vsel %vm591_vm6, %v234_v34, 0.0  ;;  %222 = vst [vmem:[#allocation2 + $0x8] sm:$0xf0] %v218_v35 }
  0x93   : > { %240 = vst [vmem:[#allocation2 + $0x10] sm:$0xf] %v238_v36 }
  0x94   : > { %v268_v37 = vpop.permute.xlu1 %267  ;;  %v211_v38 = vpop.permute.xlu0 %210 }
  0x95   : > { %v217_v39 = vsel %vm216_vm5, %v211_v38, %v213_v19 }
  0x96   : > { %221 = vst [vmem:[#allocation2] sm:$0xf0] %v217_v39 }
  0x98   : > { %v266_v40 = vpop.permute.xlu1 %265  ;;  %v270_v41 = vpop.permute.xlu0 %269  ;;  %v332_v42 = vld [vmem:[#allocation2 + $0x18] sm:$0xff] }
  0x99   : > { %v272_v43 = vsel %vm271_vm7, %v266_v40, %v268_v37  ;;  %v273_v44 = vsel %vm271_vm7, %v268_v37, %v270_v41  ;;  %v330_v45 = vld [vmem:[#allocation2 + $0x8] sm:$0xff] }
  0x9a   : > { %v276_v46 = vsel %vm591_vm6, %v272_v43, 0.0  ;;  %v277_v47 = vsel %vm578_vm4, %v273_v44, 0.0  ;;  %v340_v48 = vpack.c.bf16 %v332_v42, %v330_v45  ;;  %v331_v55 = vld [vmem:[#allocation2 + $0x10] sm:$0xff] }
  0x9b   : > { %v280_v49 = vrot.slane %v276_v46, 4  ;;  %v281_v50 = vrot.slane %v277_v47, 4 }
  0x9c   : > { %v291_v51 = vpop.permute.xlu1 %290  ;;  %v289_v52 = vpop.permute.xlu0 %288  ;;  %363 = vmatprep.subr.bf16.mxu0 %v340_v48 }
  0x9d   : > { %284 = vst [vmem:[#allocation2 + $0x20] sm:$0xf0] %v280_v49  ;;  %285 = vst [vmem:[#allocation2 + $0x28] sm:$0xf0] %v281_v50  ;;  %v294_v53 = vsel %vm292_vm8, %v289_v52, %v291_v51  ;;  %v329_v54 = vld [vmem:[#allocation2] sm:$0xff] }
  0x9e   : > { %v298_v56 = vsel %vm567_vm1, %v294_v53, 0.0  ;;  %v339_v57 = vpack.c.bf16 %v331_v55, %v329_v54 }
  0x9f   : > { %300 = vst [vmem:[#allocation2 + $0x38] sm:$0xf] %v298_v56 }
  0xa0   : > { %v182_v58 = vpop.permute.xlu1 %181  ;;  %v180_v59 = vpop.permute.xlu0 %179  ;;  %364 = vmatpush1.bf16.msra.mxu0 %v339_v57 }
  0xa1   : > { %v185_v60 = vsel %vm183_vm9, %v180_v59, %v182_v58 }
  0xa2   : > { %189 = vst [vmem:[%s611_s4 + $0x8] sm:$0xf] %v185_v60  ;;  %264 = vst [vmem:[#allocation2 + $0x28] sm:$0xf] %v185_v60 }
  0xa4   : > { %v304_v61 = vpop.permute.xlu1 %303  ;;  %v287_v62 = vpop.permute.xlu0 %286 }
  0xa5   : > { %v293_v63 = vsel %vm292_vm8, %v287_v62, %v289_v52 }
  0xa6   : > { %v297_v0 = vsel %vm563_vm0, %v293_v63, 0.0 }
  0xa7   : > { %299 = vst [vmem:[#allocation2 + $0x30] sm:$0xf] %v297_v0 }
  0xa8   : > { %v178_v1 = vpop.permute.xlu1 %177  ;;  %v306_v2 = vpop.permute.xlu0 %305 }
  0xa9   : > { %v184_v3 = vsel %vm183_vm9, %v178_v1, %v180_v59  ;;  %v309_v4 = vsel %vm307_vm10, %v304_v61, %v306_v2  ;;  %v334_v12 = vld [vmem:[#allocation2 + $0x28] sm:$0xff] }
  0xaa   : > { %188 = vst [vmem:[%s611_s4] sm:$0xf] %v184_v3  ;;  %263 = vst [vmem:[#allocation2 + $0x20] sm:$0xf] %v184_v3 }
  0xab   : > { %313 = vst [vmem:[#allocation2 + $0x38] sm:$0xf0] %v309_v4 }
  0xac   : > { %v315_v5 = vpop.permute.xlu1 %314  ;;  %v302_v6 = vpop.permute.xlu0 %301 }
  0xad   : > { %v308_v7 = vsel %vm307_vm10, %v302_v6, %v304_v61 }
  0xae   : > { %312 = vst [vmem:[#allocation2 + $0x30] sm:$0xf0] %v308_v7 }
  0xb0   : > { %v319_v9 = vpop.permute.xlu1 %318  ;;  %v317_v10 = vpop.permute.xlu0 %316 }
  0xb1   : > { %v321_v11 = vsel %vm320_vm11, %v315_v5, %v317_v10  ;;  %v322_v8 = vsel %vm320_vm11, %v317_v10, %v319_v9  ;;  %v333_v17 = vld [vmem:[#allocation2 + $0x20] sm:$0xff] }
  0xb2   : > { %v336_v13 = vld [vmem:[#allocation2 + $0x38] sm:$0xff]  ;;  %v325_v14 = vsel %vm591_vm6, %v321_v11, 0.0  ;;  %v326_v15 = vsel %vm578_vm4, %v322_v8, 0.0 }
  0xb3   : > { %v342_v16 = vpack.c.bf16 %v336_v13, %v334_v12  ;;  %327 = vst [vmem:[#allocation2 + $0x40] sm:$0xf] %v325_v14  ;;  %328 = vst [vmem:[#allocation2 + $0x48] sm:$0xf] %v326_v15 }
  0xb5   : > { %365 = vmatprep.subr.bf16.mxu0 %v342_v16  ;;  %v335_v18 = vld [vmem:[#allocation2 + $0x30] sm:$0xff] }
  0xb6   : > { %v341_v19 = vpack.c.bf16 %v335_v18, %v333_v17 }
  0xb8   : > { %366 = vmatpush1.bf16.msra.mxu0 %v341_v19 }
  0xba   : > { %v338_v21 = vld [vmem:[#allocation2 + $0x48] sm:$0xf]  ;;  %v337_v22 = vld [vmem:[#allocation2 + $0x40] sm:$0xf] }
  0xbb   : > { %v344_v23 = vpack.c.bf16 %v338_v21, %v338_v21  ;;  %v343_v24 = vpack.c.bf16 %v337_v22, %v337_v22 }
  0xbd   : > { %479 = vmatprep.subr.msk.bf16.mxu0 %vm356_vm12, %v344_v23  ;;  %v358_v25 = vsel %vm356_vm12, %v343_v24, 0 }
  0xbe   : > { %368 = vmatpush1.bf16.msra.mxu0 %v358_v25 }
  0xc1   : > { %480 = vmatmul.mubr.msk.bf16.vlgmr.msra.gmra.mrb[0].mxu0 %vm352_vm13, %v345_v20  ;;  %v350_v26 = vpop.permute.xlu0 %349 }
 0x194   : > { %v397_v27 = vpop.f32.mrb[0].mxu0 }
 0x195   : > { %v398_v28 = vadd.f32 %v397_v27, %v350_v26  ;;  %v399_v29 = vpop.f32.mrb[1].mxu0 }
 0x196   : > { %v400_v30 = vadd.f32 %v399_v29, %v350_v26  ;;  %v401_v31 = vpop.f32.mrb[2].mxu0 }
 0x197   : > { %v404_v32 = vmax.f32 %v398_v28, 0.0  ;;  %v402_v33 = vpop.f32.mrb[3].mxu0 }
 0x198   : > { %v405_v34 = vmax.f32 %v400_v30, 0.0 }
 0x199   : > { %v408_v35 = vrot.slane %v404_v32, 4 }
 0x19a   : > { %v409_v36 = vrot.slane %v405_v34, 4 }
 0x19b   : > { %412 = vst [vmem:[%s611_s4 + $0x10] ss:$-12 sps:$4 sm:$0xff] %v408_v35  }
 0x19c   : > { %413 = vst [vmem:[%s611_s4 + $0x18] ss:$-12 sps:$4 sm:$0xff] %v409_v36  }
 0x19d PF: > { %s13_s12 = sadd.s32 1, %s512_s12  }
 0x19e   : > { %p10_p4 = scmp.ge.s32.totalorder %s13_s12, 4  }
 0x1a0   :  { %12 = sbr.rel (!%p10_p4) target bundleno = 1 (0x1), region = 62 }

</bundles_post_ra>
